<compile_context>
chip_gen: v6e
topology: v6e:2x2x1
jax: 0.10.0
libtpu: 0.0.40
codegen_flags: <defaults>
</compile_context>

<pallas_src>
import functools
import math

import jax
import jax.numpy as jnp
from jax import lax
from jax.experimental import pallas as pl
from jax.experimental.pallas import tpu as pltpu


# ---------------------------------------------------------------------------
# Kernel helpers
# ---------------------------------------------------------------------------

def _layernorm(y, gamma, beta, eps=1e-5):
    """LayerNorm over the last axis (biased variance, like torch)."""
    mean = jnp.mean(y, axis=-1, keepdims=True)
    d = y - mean
    var = jnp.mean(d * d, axis=-1, keepdims=True)
    return d * lax.rsqrt(var + eps) * gamma + beta


def _transformer_block_kernel(x_ref, wqkv_ref, bqkv_ref, wo_ref, bo_ref,
                              g1_ref, bt1_ref, w1_ref, b1_ref,
                              w2_ref, b2_ref, g2_ref, bt2_ref,
                              o_ref, *, num_heads):
    """One batch element of a post-norm transformer encoder layer.

    x_ref    : (1, S, E)
    wqkv_ref : (E, 3E)   fused q/k/v projection (already transposed to (in,out))
    bqkv_ref : (1, 3E)
    wo_ref   : (E, E)    attention output projection
    bo_ref   : (1, E)
    g1/bt1   : (1, E)    LayerNorm1 gamma/beta
    w1_ref   : (E, F)    FFN linear1   b1_ref: (1, F)
    w2_ref   : (F, E)    FFN linear2   b2_ref: (1, E)
    g2/bt2   : (1, E)    LayerNorm2 gamma/beta
    o_ref    : (1, S, E)
    """
    x = x_ref[0].astype(jnp.float32)                     # (S, E)
    S, E = x.shape
    dh = E // num_heads
    scale = 1.0 / math.sqrt(dh)

    # ---- fused QKV projection: one (S,E) x (E,3E) MXU matmul -------------
    qkv = jnp.dot(x, wqkv_ref[...],
                  preferred_element_type=jnp.float32) + bqkv_ref[0]
    q = qkv[:, 0 * E:1 * E]
    k = qkv[:, 1 * E:2 * E]
    v = qkv[:, 2 * E:3 * E]

    # ---- per-head scaled dot-product attention (static head unroll) ------
    head_outs = []
    for h in range(num_heads):
        sl = slice(h * dh, (h + 1) * dh)
        qh, kh, vh = q[:, sl], k[:, sl], v[:, sl]
        # q @ k^T via contraction on last axes (no explicit transpose)
        s = lax.dot_general(qh, kh, (((1,), (1,)), ((), ())),
                            preferred_element_type=jnp.float32) * scale
        s = s - jnp.max(s, axis=-1, keepdims=True)
        p = jnp.exp(s)
        p = p / jnp.sum(p, axis=-1, keepdims=True)
        head_outs.append(jnp.dot(p, vh, preferred_element_type=jnp.float32))
    attn = jnp.concatenate(head_outs, axis=-1)            # (S, E)
    attn = jnp.dot(attn, wo_ref[...],
                   preferred_element_type=jnp.float32) + bo_ref[0]

    # ---- residual + LayerNorm 1 ------------------------------------------
    y = _layernorm(x + attn, g1_ref[0], bt1_ref[0])

    # ---- feed-forward: ReLU(y W1 + b1) W2 + b2 ----------------------------
    hdn = jnp.dot(y, w1_ref[...],
                  preferred_element_type=jnp.float32) + b1_ref[0]
    hdn = jnp.maximum(hdn, 0.0)
    ff = jnp.dot(hdn, w2_ref[...],
                 preferred_element_type=jnp.float32) + b2_ref[0]

    # ---- residual + LayerNorm 2 ------------------------------------------
    out = _layernorm(y + ff, g2_ref[0], bt2_ref[0])
    o_ref[0] = out.astype(o_ref.dtype)


# ---------------------------------------------------------------------------
# Wrapper (PyTorch parameter layout in, batch_first tensors)
# ---------------------------------------------------------------------------

def transformer_block_forward(x, params, *, num_heads):
    """Forward pass matching TransformerBlock.forward (eval mode).

    x       : (N, S, E) float32, batch_first
    params  : dict with PyTorch-layout tensors:
        in_proj_w (3E,E), in_proj_b (3E,), out_proj_w (E,E), out_proj_b (E,),
        ln1_g/ln1_b (E,), w1 (F,E), b1 (F,), w2 (E,F), b2 (E,), ln2_g/ln2_b (E,)
    returns : (N, S, E)
    """
    N, S, E = x.shape
    F = params["w1"].shape[0]

    # One-time layout prep: PyTorch stores weights as (out,in); kernel wants (in,out).
    wqkv = jnp.transpose(params["in_proj_w"]).astype(jnp.float32)      # (E, 3E)
    bqkv = params["in_proj_b"].reshape(1, 3 * E).astype(jnp.float32)
    wo = jnp.transpose(params["out_proj_w"]).astype(jnp.float32)       # (E, E)
    bo = params["out_proj_b"].reshape(1, E).astype(jnp.float32)
    g1 = params["ln1_g"].reshape(1, E).astype(jnp.float32)
    bt1 = params["ln1_b"].reshape(1, E).astype(jnp.float32)
    w1 = jnp.transpose(params["w1"]).astype(jnp.float32)               # (E, F)
    b1 = params["b1"].reshape(1, F).astype(jnp.float32)
    w2 = jnp.transpose(params["w2"]).astype(jnp.float32)               # (F, E)
    b2 = params["b2"].reshape(1, E).astype(jnp.float32)
    g2 = params["ln2_g"].reshape(1, E).astype(jnp.float32)
    bt2 = params["ln2_b"].reshape(1, E).astype(jnp.float32)

    def full(shape):
        # whole-array block, constant index map
        return pl.BlockSpec(shape, lambda n, _s=len(shape): (0,) * _s)

    kernel = functools.partial(_transformer_block_kernel, num_heads=num_heads)

    return pl.pallas_call(
        kernel,
        out_shape=jax.ShapeDtypeStruct((N, S, E), x.dtype),
        grid_spec=pltpu.PrefetchScalarGridSpec(
            num_scalar_prefetch=0,
            grid=(N,),
            in_specs=[
                pl.BlockSpec((1, S, E), lambda n: (n, 0, 0)),
                full((E, 3 * E)), full((1, 3 * E)),
                full((E, E)), full((1, E)),
                full((1, E)), full((1, E)),
                full((E, F)), full((1, F)),
                full((F, E)), full((1, E)),
                full((1, E)), full((1, E)),
            ],
            out_specs=pl.BlockSpec((1, S, E), lambda n: (n, 0, 0)),
        ),
        compiler_params=pltpu.CompilerParams(
            dimension_semantics=("parallel",),
            vmem_limit_bytes=32 << 20,
        ),
    )(x, wqkv, bqkv, wo, bo, g1, bt1, w1, b1, w2, b2, g2, bt2)


# ---------------------------------------------------------------------------
# Reference (plain JAX, eval-mode TransformerEncoderLayer) for validation
# ---------------------------------------------------------------------------

def _reference(x, params, num_heads):
    E = x.shape[-1]
    dh = E // num_heads
    hp = lax.Precision.HIGHEST

    qkv = jnp.einsum("nse,fe->nsf", x, params["in_proj_w"],
                     precision=hp) + params["in_proj_b"]
    q, k, v = jnp.split(qkv, 3, axis=-1)

    def split_heads(t):
        n, s, _ = t.shape
        return t.reshape(n, s, num_heads, dh).transpose(0, 2, 1, 3)

    qh, kh, vh = map(split_heads, (q, k, v))
    s = jnp.einsum("nhqd,nhkd->nhqk", qh, kh, precision=hp) / math.sqrt(dh)
    p = jax.nn.softmax(s, axis=-1)
    attn = jnp.einsum("nhqk,nhkd->nhqd", p, vh, precision=hp)
    attn = attn.transpose(0, 2, 1, 3).reshape(x.shape)
    attn = jnp.einsum("nse,fe->nsf", attn, params["out_proj_w"],
                      precision=hp) + params["out_proj_b"]

    def ln(t, g, b, eps=1e-5):
        m = jnp.mean(t, axis=-1, keepdims=True)
        var = jnp.mean((t - m) ** 2, axis=-1, keepdims=True)
        return (t - m) / jnp.sqrt(var + eps) * g + b

    y = ln(x + attn, params["ln1_g"], params["ln1_b"])
    h = jax.nn.relu(jnp.einsum("nse,fe->nsf", y, params["w1"],
                               precision=hp) + params["b1"])
    ff = jnp.einsum("nsf,ef->nse", h, params["w2"],
                    precision=hp) + params["b2"]
    return ln(y + ff, params["ln2_g"], params["ln2_b"])


# ---------------------------------------------------------------------------
# Main
# ---------------------------------------------------------------------------

if __name__ == "__main__":
    key = jax.random.PRNGKey(0)
    N, S, E, H, F = 2, 8, 32, 4, 64
    keys = jax.random.split(key, 12)

    def u(k, shape, fan_in):
        bound = 1.0 / math.sqrt(fan_in)
        return jax.random.uniform(k, shape, jnp.float32, -bound, bound)

    params = {
        "in_proj_w": u(keys[0], (3 * E, E), E),
        "in_proj_b": u(keys[1], (3 * E,), E),
        "out_proj_w": u(keys[2], (E, E), E),
        "out_proj_b": u(keys[3], (E,), E),
        "ln1_g": 1.0 + 0.1 * jax.random.normal(keys[4], (E,), jnp.float32),
        "ln1_b": 0.1 * jax.random.normal(keys[5], (E,), jnp.float32),
        "w1": u(keys[6], (F, E), E),
        "b1": u(keys[7], (F,), E),
        "w2": u(keys[8], (E, F), F),
        "b2": u(keys[9], (E,), F),
        "ln2_g": 1.0 + 0.1 * jax.random.normal(keys[10], (E,), jnp.float32),
        "ln2_b": 0.1 * jax.random.normal(keys[11], (E,), jnp.float32),
    }

    x = jax.random.normal(jax.random.PRNGKey(1), (N, S, E), jnp.float32)

    out = transformer_block_forward(x, params, num_heads=H)
    out = jax.block_until_ready(out)
    ref = _reference(x, params, H)

    assert out.shape == (N, S, E)
    err = float(jnp.max(jnp.abs(out - ref)))
    assert jnp.allclose(out, ref, atol=1e-3, rtol=1e-3), f"max abs err {err}"

    print("KERNEL_OK")
</pallas_src>

<mosaic_0001>
module attributes {stable_mosaic.version = 11 : i64} {
  func.func @_transformer_block_kernel(%arg0: i32, %arg1: memref<1x8x32xf32, #tpu.memory_space<vmem>>, %arg2: memref<32x96xf32, #tpu.memory_space<vmem>>, %arg3: memref<1x96xf32, #tpu.memory_space<vmem>>, %arg4: memref<32x32xf32, #tpu.memory_space<vmem>>, %arg5: memref<1x32xf32, #tpu.memory_space<vmem>>, %arg6: memref<1x32xf32, #tpu.memory_space<vmem>>, %arg7: memref<1x32xf32, #tpu.memory_space<vmem>>, %arg8: memref<32x64xf32, #tpu.memory_space<vmem>>, %arg9: memref<1x64xf32, #tpu.memory_space<vmem>>, %arg10: memref<64x32xf32, #tpu.memory_space<vmem>>, %arg11: memref<1x32xf32, #tpu.memory_space<vmem>>, %arg12: memref<1x32xf32, #tpu.memory_space<vmem>>, %arg13: memref<1x32xf32, #tpu.memory_space<vmem>>, %arg14: memref<1x8x32xf32, #tpu.memory_space<vmem>>) attributes {dimension_semantics = [#tpu.dimension_semantics<parallel>], iteration_bounds = array<i64: 2>, scalar_prefetch = 0 : i64, scratch_operands = 0 : i64, tpu.core_type = #tpu.core_type<tc>, window_params = [{transform_indices = @transform_0, window_bounds = array<i64: 1, 8, 32>}, {pipeline_mode = #tpu.pipeline_mode<synchronous>, transform_indices = @transform_1, window_bounds = array<i64: 32, 96>}, {pipeline_mode = #tpu.pipeline_mode<synchronous>, transform_indices = @transform_2, window_bounds = array<i64: 1, 96>}, {pipeline_mode = #tpu.pipeline_mode<synchronous>, transform_indices = @transform_3, window_bounds = array<i64: 32, 32>}, {pipeline_mode = #tpu.pipeline_mode<synchronous>, transform_indices = @transform_4, window_bounds = array<i64: 1, 32>}, {pipeline_mode = #tpu.pipeline_mode<synchronous>, transform_indices = @transform_5, window_bounds = array<i64: 1, 32>}, {pipeline_mode = #tpu.pipeline_mode<synchronous>, transform_indices = @transform_6, window_bounds = array<i64: 1, 32>}, {pipeline_mode = #tpu.pipeline_mode<synchronous>, transform_indices = @transform_7, window_bounds = array<i64: 32, 64>}, {pipeline_mode = #tpu.pipeline_mode<synchronous>, transform_indices = @transform_8, window_bounds = array<i64: 1, 64>}, {pipeline_mode = #tpu.pipeline_mode<synchronous>, transform_indices = @transform_9, window_bounds = array<i64: 64, 32>}, {pipeline_mode = #tpu.pipeline_mode<synchronous>, transform_indices = @transform_10, window_bounds = array<i64: 1, 32>}, {pipeline_mode = #tpu.pipeline_mode<synchronous>, transform_indices = @transform_11, window_bounds = array<i64: 1, 32>}, {pipeline_mode = #tpu.pipeline_mode<synchronous>, transform_indices = @transform_12, window_bounds = array<i64: 1, 32>}, {transform_indices = @transform_13, window_bounds = array<i64: 1, 8, 32>}]} {
    %c0 = arith.constant 0 : index
    %c0_0 = arith.constant 0 : index
    %c0_1 = arith.constant 0 : index
    %0 = vector.load %arg1[%c0, %c0_0, %c0_1] : memref<1x8x32xf32, #tpu.memory_space<vmem>>, vector<1x8x32xf32>
    %1 = vector.shape_cast %0 : vector<1x8x32xf32> to vector<8x32xf32>
    %c0_2 = arith.constant 0 : index
    %c0_3 = arith.constant 0 : index
    %2 = vector.load %arg2[%c0_2, %c0_3] : memref<32x96xf32, #tpu.memory_space<vmem>>, vector<32x96xf32>
    %cst = arith.constant dense<0.000000e+00> : vector<8x96xf32>
    %3 = tpu.matmul %1, %2, %cst {dimension_numbers = #tpu.dot_dimension_numbers<[1], [0], [0], [1], [0, 0, 1, 1], [], []>} : vector<8x32xf32>, vector<32x96xf32>, vector<8x96xf32> -> vector<8x96xf32>
    %c0_4 = arith.constant 0 : index
    %c0_5 = arith.constant 0 : index
    %4 = vector.load %arg3[%c0_4, %c0_5] : memref<1x96xf32, #tpu.memory_space<vmem>>, vector<1x96xf32>
    %5 = vector.shape_cast %4 : vector<1x96xf32> to vector<96xf32>
    %6 = vector.shape_cast %5 : vector<96xf32> to vector<1x96xf32>
    %7 = vector.broadcast %6 : vector<1x96xf32> to vector<8x96xf32>
    %8 = arith.addf %3, %7 : vector<8x96xf32>
    %9 = vector.extract_strided_slice %8 {offsets = [0, 0], sizes = [8, 32], strides = [1, 1]} : vector<8x96xf32> to vector<8x32xf32>
    %10 = vector.extract_strided_slice %8 {offsets = [0, 32], sizes = [8, 32], strides = [1, 1]} : vector<8x96xf32> to vector<8x32xf32>
    %11 = vector.extract_strided_slice %8 {offsets = [0, 64], sizes = [8, 32], strides = [1, 1]} : vector<8x96xf32> to vector<8x32xf32>
    %12 = vector.extract_strided_slice %9 {offsets = [0, 0], sizes = [8, 8], strides = [1, 1]} : vector<8x32xf32> to vector<8x8xf32>
    %13 = vector.extract_strided_slice %10 {offsets = [0, 0], sizes = [8, 8], strides = [1, 1]} : vector<8x32xf32> to vector<8x8xf32>
    %14 = vector.extract_strided_slice %11 {offsets = [0, 0], sizes = [8, 8], strides = [1, 1]} : vector<8x32xf32> to vector<8x8xf32>
    %cst_6 = arith.constant dense<0.000000e+00> : vector<8x8xf32>
    %15 = tpu.matmul %12, %13, %cst_6 {dimension_numbers = #tpu.dot_dimension_numbers<[1], [1], [0], [0], [0, 0, 1, 0], [], []>} : vector<8x8xf32>, vector<8x8xf32>, vector<8x8xf32> -> vector<8x8xf32>
    %cst_7 = arith.constant 0.353553385 : f32
    %16 = vector.broadcast %cst_7 : f32 to vector<8x8xf32>
    %17 = arith.mulf %15, %16 : vector<8x8xf32>
    %cst_8 = arith.constant dense<0xFF800000> : vector<8xf32>
    %18 = vector.multi_reduction <maximumf>, %17, %cst_8 [1] : vector<8x8xf32> to vector<8xf32>
    %19 = vector.shape_cast %18 : vector<8xf32> to vector<8x1xf32>
    %20 = vector.broadcast %19 : vector<8x1xf32> to vector<8x8xf32>
    %21 = arith.subf %17, %20 : vector<8x8xf32>
    %22 = math.exp %21 : vector<8x8xf32>
    %cst_9 = arith.constant dense<0.000000e+00> : vector<8xf32>
    %23 = vector.multi_reduction <add>, %22, %cst_9 [1] : vector<8x8xf32> to vector<8xf32>
    %24 = vector.shape_cast %23 : vector<8xf32> to vector<8x1xf32>
    %25 = vector.broadcast %24 : vector<8x1xf32> to vector<8x8xf32>
    %26 = arith.divf %22, %25 : vector<8x8xf32>
    %cst_10 = arith.constant dense<0.000000e+00> : vector<8x8xf32>
    %27 = tpu.matmul %26, %14, %cst_10 {dimension_numbers = #tpu.dot_dimension_numbers<[1], [0], [0], [1], [0, 0, 1, 1], [], []>} : vector<8x8xf32>, vector<8x8xf32>, vector<8x8xf32> -> vector<8x8xf32>
    %28 = vector.extract_strided_slice %9 {offsets = [0, 8], sizes = [8, 8], strides = [1, 1]} : vector<8x32xf32> to vector<8x8xf32>
    %29 = vector.extract_strided_slice %10 {offsets = [0, 8], sizes = [8, 8], strides = [1, 1]} : vector<8x32xf32> to vector<8x8xf32>
    %30 = vector.extract_strided_slice %11 {offsets = [0, 8], sizes = [8, 8], strides = [1, 1]} : vector<8x32xf32> to vector<8x8xf32>
    %cst_11 = arith.constant dense<0.000000e+00> : vector<8x8xf32>
    %31 = tpu.matmul %28, %29, %cst_11 {dimension_numbers = #tpu.dot_dimension_numbers<[1], [1], [0], [0], [0, 0, 1, 0], [], []>} : vector<8x8xf32>, vector<8x8xf32>, vector<8x8xf32> -> vector<8x8xf32>
    %cst_12 = arith.constant 0.353553385 : f32
    %32 = vector.broadcast %cst_12 : f32 to vector<8x8xf32>
    %33 = arith.mulf %31, %32 : vector<8x8xf32>
    %cst_13 = arith.constant dense<0xFF800000> : vector<8xf32>
    %34 = vector.multi_reduction <maximumf>, %33, %cst_13 [1] : vector<8x8xf32> to vector<8xf32>
    %35 = vector.shape_cast %34 : vector<8xf32> to vector<8x1xf32>
    %36 = vector.broadcast %35 : vector<8x1xf32> to vector<8x8xf32>
    %37 = arith.subf %33, %36 : vector<8x8xf32>
    %38 = math.exp %37 : vector<8x8xf32>
    %cst_14 = arith.constant dense<0.000000e+00> : vector<8xf32>
    %39 = vector.multi_reduction <add>, %38, %cst_14 [1] : vector<8x8xf32> to vector<8xf32>
    %40 = vector.shape_cast %39 : vector<8xf32> to vector<8x1xf32>
    %41 = vector.broadcast %40 : vector<8x1xf32> to vector<8x8xf32>
    %42 = arith.divf %38, %41 : vector<8x8xf32>
    %cst_15 = arith.constant dense<0.000000e+00> : vector<8x8xf32>
    %43 = tpu.matmul %42, %30, %cst_15 {dimension_numbers = #tpu.dot_dimension_numbers<[1], [0], [0], [1], [0, 0, 1, 1], [], []>} : vector<8x8xf32>, vector<8x8xf32>, vector<8x8xf32> -> vector<8x8xf32>
    %44 = vector.extract_strided_slice %9 {offsets = [0, 16], sizes = [8, 8], strides = [1, 1]} : vector<8x32xf32> to vector<8x8xf32>
    %45 = vector.extract_strided_slice %10 {offsets = [0, 16], sizes = [8, 8], strides = [1, 1]} : vector<8x32xf32> to vector<8x8xf32>
    %46 = vector.extract_strided_slice %11 {offsets = [0, 16], sizes = [8, 8], strides = [1, 1]} : vector<8x32xf32> to vector<8x8xf32>
    %cst_16 = arith.constant dense<0.000000e+00> : vector<8x8xf32>
    %47 = tpu.matmul %44, %45, %cst_16 {dimension_numbers = #tpu.dot_dimension_numbers<[1], [1], [0], [0], [0, 0, 1, 0], [], []>} : vector<8x8xf32>, vector<8x8xf32>, vector<8x8xf32> -> vector<8x8xf32>
    %cst_17 = arith.constant 0.353553385 : f32
    %48 = vector.broadcast %cst_17 : f32 to vector<8x8xf32>
    %49 = arith.mulf %47, %48 : vector<8x8xf32>
    %cst_18 = arith.constant dense<0xFF800000> : vector<8xf32>
    %50 = vector.multi_reduction <maximumf>, %49, %cst_18 [1] : vector<8x8xf32> to vector<8xf32>
    %51 = vector.shape_cast %50 : vector<8xf32> to vector<8x1xf32>
    %52 = vector.broadcast %51 : vector<8x1xf32> to vector<8x8xf32>
    %53 = arith.subf %49, %52 : vector<8x8xf32>
    %54 = math.exp %53 : vector<8x8xf32>
    %cst_19 = arith.constant dense<0.000000e+00> : vector<8xf32>
    %55 = vector.multi_reduction <add>, %54, %cst_19 [1] : vector<8x8xf32> to vector<8xf32>
    %56 = vector.shape_cast %55 : vector<8xf32> to vector<8x1xf32>
    %57 = vector.broadcast %56 : vector<8x1xf32> to vector<8x8xf32>
    %58 = arith.divf %54, %57 : vector<8x8xf32>
    %cst_20 = arith.constant dense<0.000000e+00> : vector<8x8xf32>
    %59 = tpu.matmul %58, %46, %cst_20 {dimension_numbers = #tpu.dot_dimension_numbers<[1], [0], [0], [1], [0, 0, 1, 1], [], []>} : vector<8x8xf32>, vector<8x8xf32>, vector<8x8xf32> -> vector<8x8xf32>
    %60 = vector.extract_strided_slice %9 {offsets = [0, 24], sizes = [8, 8], strides = [1, 1]} : vector<8x32xf32> to vector<8x8xf32>
    %61 = vector.extract_strided_slice %10 {offsets = [0, 24], sizes = [8, 8], strides = [1, 1]} : vector<8x32xf32> to vector<8x8xf32>
    %62 = vector.extract_strided_slice %11 {offsets = [0, 24], sizes = [8, 8], strides = [1, 1]} : vector<8x32xf32> to vector<8x8xf32>
    %cst_21 = arith.constant dense<0.000000e+00> : vector<8x8xf32>
    %63 = tpu.matmul %60, %61, %cst_21 {dimension_numbers = #tpu.dot_dimension_numbers<[1], [1], [0], [0], [0, 0, 1, 0], [], []>} : vector<8x8xf32>, vector<8x8xf32>, vector<8x8xf32> -> vector<8x8xf32>
    %cst_22 = arith.constant 0.353553385 : f32
    %64 = vector.broadcast %cst_22 : f32 to vector<8x8xf32>
    %65 = arith.mulf %63, %64 : vector<8x8xf32>
    %cst_23 = arith.constant dense<0xFF800000> : vector<8xf32>
    %66 = vector.multi_reduction <maximumf>, %65, %cst_23 [1] : vector<8x8xf32> to vector<8xf32>
    %67 = vector.shape_cast %66 : vector<8xf32> to vector<8x1xf32>
    %68 = vector.broadcast %67 : vector<8x1xf32> to vector<8x8xf32>
    %69 = arith.subf %65, %68 : vector<8x8xf32>
    %70 = math.exp %69 : vector<8x8xf32>
    %cst_24 = arith.constant dense<0.000000e+00> : vector<8xf32>
    %71 = vector.multi_reduction <add>, %70, %cst_24 [1] : vector<8x8xf32> to vector<8xf32>
    %72 = vector.shape_cast %71 : vector<8xf32> to vector<8x1xf32>
    %73 = vector.broadcast %72 : vector<8x1xf32> to vector<8x8xf32>
    %74 = arith.divf %70, %73 : vector<8x8xf32>
    %cst_25 = arith.constant dense<0.000000e+00> : vector<8x8xf32>
    %75 = tpu.matmul %74, %62, %cst_25 {dimension_numbers = #tpu.dot_dimension_numbers<[1], [0], [0], [1], [0, 0, 1, 1], [], []>} : vector<8x8xf32>, vector<8x8xf32>, vector<8x8xf32> -> vector<8x8xf32>
    %76 = tpu.concatenate %27, %43, %59, %75 in 1 : vector<8x8xf32>, vector<8x8xf32>, vector<8x8xf32>, vector<8x8xf32> -> vector<8x32xf32>
    %c0_26 = arith.constant 0 : index
    %c0_27 = arith.constant 0 : index
    %77 = vector.load %arg4[%c0_26, %c0_27] : memref<32x32xf32, #tpu.memory_space<vmem>>, vector<32x32xf32>
    %cst_28 = arith.constant dense<0.000000e+00> : vector<8x32xf32>
    %78 = tpu.matmul %76, %77, %cst_28 {dimension_numbers = #tpu.dot_dimension_numbers<[1], [0], [0], [1], [0, 0, 1, 1], [], []>} : vector<8x32xf32>, vector<32x32xf32>, vector<8x32xf32> -> vector<8x32xf32>
    %c0_29 = arith.constant 0 : index
    %c0_30 = arith.constant 0 : index
    %79 = vector.load %arg5[%c0_29, %c0_30] : memref<1x32xf32, #tpu.memory_space<vmem>>, vector<1x32xf32>
    %80 = vector.shape_cast %79 : vector<1x32xf32> to vector<32xf32>
    %81 = vector.shape_cast %80 : vector<32xf32> to vector<1x32xf32>
    %82 = vector.broadcast %81 : vector<1x32xf32> to vector<8x32xf32>
    %83 = arith.addf %78, %82 : vector<8x32xf32>
    %84 = arith.addf %1, %83 : vector<8x32xf32>
    %c0_31 = arith.constant 0 : index
    %c0_32 = arith.constant 0 : index
    %85 = vector.load %arg6[%c0_31, %c0_32] : memref<1x32xf32, #tpu.memory_space<vmem>>, vector<1x32xf32>
    %86 = vector.shape_cast %85 : vector<1x32xf32> to vector<32xf32>
    %c0_33 = arith.constant 0 : index
    %c0_34 = arith.constant 0 : index
    %87 = vector.load %arg7[%c0_33, %c0_34] : memref<1x32xf32, #tpu.memory_space<vmem>>, vector<1x32xf32>
    %88 = vector.shape_cast %87 : vector<1x32xf32> to vector<32xf32>
    %cst_35 = arith.constant dense<0.000000e+00> : vector<8xf32>
    %89 = vector.multi_reduction <add>, %84, %cst_35 [1] : vector<8x32xf32> to vector<8xf32>
    %90 = vector.shape_cast %89 : vector<8xf32> to vector<8x1xf32>
    %cst_36 = arith.constant 3.200000e+01 : f32
    %91 = vector.broadcast %cst_36 : f32 to vector<8x1xf32>
    %92 = arith.divf %90, %91 : vector<8x1xf32>
    %93 = vector.broadcast %92 : vector<8x1xf32> to vector<8x32xf32>
    %94 = arith.subf %84, %93 : vector<8x32xf32>
    %95 = arith.mulf %94, %94 : vector<8x32xf32>
    %cst_37 = arith.constant dense<0.000000e+00> : vector<8xf32>
    %96 = vector.multi_reduction <add>, %95, %cst_37 [1] : vector<8x32xf32> to vector<8xf32>
    %97 = vector.shape_cast %96 : vector<8xf32> to vector<8x1xf32>
    %cst_38 = arith.constant 3.200000e+01 : f32
    %98 = vector.broadcast %cst_38 : f32 to vector<8x1xf32>
    %99 = arith.divf %97, %98 : vector<8x1xf32>
    %cst_39 = arith.constant 9.99999974E-6 : f32
    %100 = vector.broadcast %cst_39 : f32 to vector<8x1xf32>
    %101 = arith.addf %99, %100 : vector<8x1xf32>
    %102 = math.rsqrt %101 : vector<8x1xf32>
    %103 = vector.broadcast %102 : vector<8x1xf32> to vector<8x32xf32>
    %104 = arith.mulf %94, %103 : vector<8x32xf32>
    %105 = vector.shape_cast %86 : vector<32xf32> to vector<1x32xf32>
    %106 = vector.broadcast %105 : vector<1x32xf32> to vector<8x32xf32>
    %107 = arith.mulf %104, %106 : vector<8x32xf32>
    %108 = vector.shape_cast %88 : vector<32xf32> to vector<1x32xf32>
    %109 = vector.broadcast %108 : vector<1x32xf32> to vector<8x32xf32>
    %110 = arith.addf %107, %109 : vector<8x32xf32>
    %c0_40 = arith.constant 0 : index
    %c0_41 = arith.constant 0 : index
    %111 = vector.load %arg8[%c0_40, %c0_41] : memref<32x64xf32, #tpu.memory_space<vmem>>, vector<32x64xf32>
    %cst_42 = arith.constant dense<0.000000e+00> : vector<8x64xf32>
    %112 = tpu.matmul %110, %111, %cst_42 {dimension_numbers = #tpu.dot_dimension_numbers<[1], [0], [0], [1], [0, 0, 1, 1], [], []>} : vector<8x32xf32>, vector<32x64xf32>, vector<8x64xf32> -> vector<8x64xf32>
    %c0_43 = arith.constant 0 : index
    %c0_44 = arith.constant 0 : index
    %113 = vector.load %arg9[%c0_43, %c0_44] : memref<1x64xf32, #tpu.memory_space<vmem>>, vector<1x64xf32>
    %114 = vector.shape_cast %113 : vector<1x64xf32> to vector<64xf32>
    %115 = vector.shape_cast %114 : vector<64xf32> to vector<1x64xf32>
    %116 = vector.broadcast %115 : vector<1x64xf32> to vector<8x64xf32>
    %117 = arith.addf %112, %116 : vector<8x64xf32>
    %cst_45 = arith.constant 0.000000e+00 : f32
    %118 = vector.broadcast %cst_45 : f32 to vector<8x64xf32>
    %119 = arith.maximumf %117, %118 : vector<8x64xf32>
    %c0_46 = arith.constant 0 : index
    %c0_47 = arith.constant 0 : index
    %120 = vector.load %arg10[%c0_46, %c0_47] : memref<64x32xf32, #tpu.memory_space<vmem>>, vector<64x32xf32>
    %cst_48 = arith.constant dense<0.000000e+00> : vector<8x32xf32>
    %121 = tpu.matmul %119, %120, %cst_48 {dimension_numbers = #tpu.dot_dimension_numbers<[1], [0], [0], [1], [0, 0, 1, 1], [], []>} : vector<8x64xf32>, vector<64x32xf32>, vector<8x32xf32> -> vector<8x32xf32>
    %c0_49 = arith.constant 0 : index
    %c0_50 = arith.constant 0 : index
    %122 = vector.load %arg11[%c0_49, %c0_50] : memref<1x32xf32, #tpu.memory_space<vmem>>, vector<1x32xf32>
    %123 = vector.shape_cast %122 : vector<1x32xf32> to vector<32xf32>
    %124 = vector.shape_cast %123 : vector<32xf32> to vector<1x32xf32>
    %125 = vector.broadcast %124 : vector<1x32xf32> to vector<8x32xf32>
    %126 = arith.addf %121, %125 : vector<8x32xf32>
    %127 = arith.addf %110, %126 : vector<8x32xf32>
    %c0_51 = arith.constant 0 : index
    %c0_52 = arith.constant 0 : index
    %128 = vector.load %arg12[%c0_51, %c0_52] : memref<1x32xf32, #tpu.memory_space<vmem>>, vector<1x32xf32>
    %129 = vector.shape_cast %128 : vector<1x32xf32> to vector<32xf32>
    %c0_53 = arith.constant 0 : index
    %c0_54 = arith.constant 0 : index
    %130 = vector.load %arg13[%c0_53, %c0_54] : memref<1x32xf32, #tpu.memory_space<vmem>>, vector<1x32xf32>
    %131 = vector.shape_cast %130 : vector<1x32xf32> to vector<32xf32>
    %cst_55 = arith.constant dense<0.000000e+00> : vector<8xf32>
    %132 = vector.multi_reduction <add>, %127, %cst_55 [1] : vector<8x32xf32> to vector<8xf32>
    %133 = vector.shape_cast %132 : vector<8xf32> to vector<8x1xf32>
    %cst_56 = arith.constant 3.200000e+01 : f32
    %134 = vector.broadcast %cst_56 : f32 to vector<8x1xf32>
    %135 = arith.divf %133, %134 : vector<8x1xf32>
    %136 = vector.broadcast %135 : vector<8x1xf32> to vector<8x32xf32>
    %137 = arith.subf %127, %136 : vector<8x32xf32>
    %138 = arith.mulf %137, %137 : vector<8x32xf32>
    %cst_57 = arith.constant dense<0.000000e+00> : vector<8xf32>
    %139 = vector.multi_reduction <add>, %138, %cst_57 [1] : vector<8x32xf32> to vector<8xf32>
    %140 = vector.shape_cast %139 : vector<8xf32> to vector<8x1xf32>
    %cst_58 = arith.constant 3.200000e+01 : f32
    %141 = vector.broadcast %cst_58 : f32 to vector<8x1xf32>
    %142 = arith.divf %140, %141 : vector<8x1xf32>
    %cst_59 = arith.constant 9.99999974E-6 : f32
    %143 = vector.broadcast %cst_59 : f32 to vector<8x1xf32>
    %144 = arith.addf %142, %143 : vector<8x1xf32>
    %145 = math.rsqrt %144 : vector<8x1xf32>
    %146 = vector.broadcast %145 : vector<8x1xf32> to vector<8x32xf32>
    %147 = arith.mulf %137, %146 : vector<8x32xf32>
    %148 = vector.shape_cast %129 : vector<32xf32> to vector<1x32xf32>
    %149 = vector.broadcast %148 : vector<1x32xf32> to vector<8x32xf32>
    %150 = arith.mulf %147, %149 : vector<8x32xf32>
    %151 = vector.shape_cast %131 : vector<32xf32> to vector<1x32xf32>
    %152 = vector.broadcast %151 : vector<1x32xf32> to vector<8x32xf32>
    %153 = arith.addf %150, %152 : vector<8x32xf32>
    %c0_60 = arith.constant 0 : index
    %c0_61 = arith.constant 0 : index
    %c0_62 = arith.constant 0 : index
    %154 = vector.load %arg14[%c0_60, %c0_61, %c0_62] : memref<1x8x32xf32, #tpu.memory_space<vmem>>, vector<1x8x32xf32>
    %155 = vector.shape_cast %154 : vector<1x8x32xf32> to vector<8x32xf32>
    %156 = vector.shape_cast %153 : vector<8x32xf32> to vector<1x8x32xf32>
    tpu.vector_store %arg14[%c0_60, %c0_61, %c0_62], %156 {strides = array<i32>} : memref<1x8x32xf32, #tpu.memory_space<vmem>>, vector<1x8x32xf32>,
    return
  }
  func.func @transform_0(%arg0: i32) -> (i32, i32, i32) {
    %c0_i32 = arith.constant 0 : i32
    %c0_i32_0 = arith.constant 0 : i32
    %c0_i32_1 = arith.constant 0 : i32
    return %arg0, %c0_i32, %c0_i32_0 : i32, i32, i32
  }
  func.func @transform_1(%arg0: i32) -> (i32, i32) {
    %c0_i32 = arith.constant 0 : i32
    %c0_i32_0 = arith.constant 0 : i32
    %c0_i32_1 = arith.constant 0 : i32
    return %c0_i32, %c0_i32_0 : i32, i32
  }
  func.func @transform_2(%arg0: i32) -> (i32, i32) {
    %c0_i32 = arith.constant 0 : i32
    %c0_i32_0 = arith.constant 0 : i32
    %c0_i32_1 = arith.constant 0 : i32
    return %c0_i32, %c0_i32_0 : i32, i32
  }
  func.func @transform_3(%arg0: i32) -> (i32, i32) {
    %c0_i32 = arith.constant 0 : i32
    %c0_i32_0 = arith.constant 0 : i32
    %c0_i32_1 = arith.constant 0 : i32
    return %c0_i32, %c0_i32_0 : i32, i32
  }
  func.func @transform_4(%arg0: i32) -> (i32, i32) {
    %c0_i32 = arith.constant 0 : i32
    %c0_i32_0 = arith.constant 0 : i32
    %c0_i32_1 = arith.constant 0 : i32
    return %c0_i32, %c0_i32_0 : i32, i32
  }
  func.func @transform_5(%arg0: i32) -> (i32, i32) {
    %c0_i32 = arith.constant 0 : i32
    %c0_i32_0 = arith.constant 0 : i32
    %c0_i32_1 = arith.constant 0 : i32
    return %c0_i32, %c0_i32_0 : i32, i32
  }
  func.func @transform_6(%arg0: i32) -> (i32, i32) {
    %c0_i32 = arith.constant 0 : i32
    %c0_i32_0 = arith.constant 0 : i32
    %c0_i32_1 = arith.constant 0 : i32
    return %c0_i32, %c0_i32_0 : i32, i32
  }
  func.func @transform_7(%arg0: i32) -> (i32, i32) {
    %c0_i32 = arith.constant 0 : i32
    %c0_i32_0 = arith.constant 0 : i32
    %c0_i32_1 = arith.constant 0 : i32
    return %c0_i32, %c0_i32_0 : i32, i32
  }
  func.func @transform_8(%arg0: i32) -> (i32, i32) {
    %c0_i32 = arith.constant 0 : i32
    %c0_i32_0 = arith.constant 0 : i32
    %c0_i32_1 = arith.constant 0 : i32
    return %c0_i32, %c0_i32_0 : i32, i32
  }
  func.func @transform_9(%arg0: i32) -> (i32, i32) {
    %c0_i32 = arith.constant 0 : i32
    %c0_i32_0 = arith.constant 0 : i32
    %c0_i32_1 = arith.constant 0 : i32
    return %c0_i32, %c0_i32_0 : i32, i32
  }
  func.func @transform_10(%arg0: i32) -> (i32, i32) {
    %c0_i32 = arith.constant 0 : i32
    %c0_i32_0 = arith.constant 0 : i32
    %c0_i32_1 = arith.constant 0 : i32
    return %c0_i32, %c0_i32_0 : i32, i32
  }
  func.func @transform_11(%arg0: i32) -> (i32, i32) {
    %c0_i32 = arith.constant 0 : i32
    %c0_i32_0 = arith.constant 0 : i32
    %c0_i32_1 = arith.constant 0 : i32
    return %c0_i32, %c0_i32_0 : i32, i32
  }
  func.func @transform_12(%arg0: i32) -> (i32, i32) {
    %c0_i32 = arith.constant 0 : i32
    %c0_i32_0 = arith.constant 0 : i32
    %c0_i32_1 = arith.constant 0 : i32
    return %c0_i32, %c0_i32_0 : i32, i32
  }
  func.func @transform_13(%arg0: i32) -> (i32, i32, i32) {
    %c0_i32 = arith.constant 0 : i32
    %c0_i32_0 = arith.constant 0 : i32
    %c0_i32_1 = arith.constant 0 : i32
    return %arg0, %c0_i32, %c0_i32_0 : i32, i32, i32
  }
}

</mosaic_0001>

<bundles_post_ra>
// kernel: tpu_custom_call.1
= control target key start
LH: loop header
LB: loop body
LE: loop exit
PB: predicated region body
PF: predicated region fallthrough
CT: control target
= control target key end

     0   :  { %s2387_s0 = inlined_call_operand.hbm [shape: f32[2,8,32], index: 0, kind: input, shape index: {}]   ;;  %s2388_s1 = inlined_call_operand.vmem [shape: f32[32,96], index: 1, kind: input, shape index: {}]   ;;  %s2389_s2 = inlined_call_operand.vmem [shape: f32[1,96], index: 2, kind: input, shape index: {}]   ;;  %s2390_s3 = inlined_call_operand.vmem [shape: f32[32,32], index: 3, kind: input, shape index: {}]   ;;  %s2391_s4 = inlined_call_operand.vmem [shape: f32[1,32], index: 4, kind: input, shape index: {}]   ;;  %s2392_s5 = inlined_call_operand.vmem [shape: f32[1,32], index: 5, kind: input, shape index: {}]   ;;  %s2393_s6 = inlined_call_operand.vmem [shape: f32[1,32], index: 6, kind: input, shape index: {}]   ;;  %s2394_s7 = inlined_call_operand.vmem [shape: f32[32,64], index: 7, kind: input, shape index: {}]   ;;  %s2395_s8 = inlined_call_operand.vmem [shape: f32[1,64], index: 8, kind: input, shape index: {}]   ;;  %s2396_s9 = inlined_call_operand.vmem [shape: f32[64,32], index: 9, kind: input, shape index: {}]   ;;  %s2397_s10 = inlined_call_operand.vmem [shape: f32[1,32], index: 10, kind: input, shape index: {}]   ;;  %s2398_s11 = inlined_call_operand.vmem [shape: f32[1,32], index: 11, kind: input, shape index: {}]   ;;  %s2399_s12 = inlined_call_operand.vmem [shape: f32[1,32], index: 12, kind: input, shape index: {}]   ;;  %s2400_s13 = inlined_call_operand.hbm [shape: f32[2,8,32], index: 13, kind: output, shape index: {}]  }
   0x1   :  { %2409 = sst [smem:[#allocation13_spill]] %s2400_s13 }
   0x2   :  { %18 = vsyncpa [#allocation3], 0 }
   0x3   :  { %20 = vsyncpa [#allocation3 + $0x1], 0 }
   0x4   :  { %21 = vsyncpa [#allocation4], 0 }
   0x5   :  { %23 = vsyncpa [#allocation4 + $0x1], 0  ;;  %s2059_s25 = smov 0   ;;  %s2061_s26 = smov 0  }
   0x6   :  { %s2063_s27 = smov 0   ;;  %s2065_s28 = smov 0  }
   0x7 LB: > { %2410 = sst [smem:[#allocation8_spill]] %s1957_s25  ;;  %s2080_s29 = sadd.s32 4294967295, %s1969_s28   ;;  %s1969_s28 = sphi %s2065_s28, %s2429_s28   ;;  %s1965_s27 = sphi %s2063_s27, %s2431_s27   ;;  %s1961_s26 = sphi %s2061_s26, %s2433_s26   ;;  %s1957_s25 = sphi %s2059_s25, %s2432_s25  }
   0x8   : > { %2411 = sst [smem:[#allocation9_spill]] %s1965_s27  ;;  %s1627_s30 = sadd.s32 4294967294, %s1969_s28  }
   0x9   : > { %s2084_s14 = sadd.s32 1, %s1969_s28   ;;  %s36_s15 = sadd.s32 1, %s1965_s27 }
   0xa   : > { %2412 = sst [smem:[#allocation10_spill]] %s2084_s14  ;;  %s33_s16 = ssub.s32 %s1969_s28, %s2084_s14 }
   0xb   : > { %p43_p0 = scmp.ne.s32.totalorder %s1965_s27, %s1961_s26  ;;  %p34_p1 = scmp.eq.s32.totalorder %s33_s16, 0 }
   0xc   : > { %p44_p2 = scmp.eq.s32.totalorder %s1969_s28, 0  ;;  %p49_p3 = scmp.ne.s32.totalorder %s1961_s26, %s1957_s25 }
   0xd   : > { %p50_p4 = scmp.eq.s32.totalorder %s2080_s29, 0  ;;  %p325_p7 = scmp.eq.s32.totalorder %s2080_s29, 1 }
   0xe   : > { %s2096_s17 = scalar_select %p34_p1, %s1965_s27, %s36_s15  }
   0xf   : > { %p2098_p5 = por %p44_p2, %p43_p0  ;;  %p2102_p6 = por %p50_p4, %p49_p3 }
  0x10   : > { %2413 = sst [smem:[#allocation11_spill]] %s2096_s17  ;;  %p331_p8 = scmp.eq.s32.totalorder %s1627_s30, 1 }
  0x11   : > { %s2415_s19 = scalar_select %p2102_p6, 1, 0 }
  0x12   : > { %p1807_p10 = scmp.lt.s32.totalorder %s1969_s28, 2  ;;  %p2109_p11 = por %p325_p7, %p43_p0 }
  0x13   : > { %p2113_p12 = por %p331_p8, %p49_p3  ;;  %s387_s22 = sand.u32 1, %s1965_s27  }
  0x14   : > { %s2416_s20 = scalar_select %p2109_p11, 1, 0 }
  0x15   : > { %s2417_s21 = scalar_select %p2113_p12, 1, 0 }
  0x16   : > { %s1631_s23 = sshll.u32 %s1969_s28, 7  ;;  %s1630_s24 = sshll.u32 %s387_s22, 3 }
  0x17   : > { %2418 = sst [smem:[#allocation12_spill]] %s2417_s21  ;;  %s2122_s17 = scalar_lea.hbm %s2387_s0, %s1631_s23 }
  0x18   : > { %s391_s30 = scalar_lea.vmem [#allocation2], %s1630_s24  ;;  %p2126_p13 = pnand %p1807_p10, %p2098_p5 }
  0x19   : > { %s398_s14 = sshll.u32 %s391_s30, 4  ;;  %s388_s27 = scalar_lea.sflag [#allocation3], %s387_s22  ;;  %s2130_s14 = int_to_ptr.vmem [resolvable:$true] %s398_s14 }
  0x1a   : > { %s1877_s21 = scalar_lea.hbm %s2122_s17, 128  ;;  %p1879_p3 = pneg %p2126_p13 }
  0x1b   : > { %p1878_p2 = scmp.ne.s32.totalorder %s2122_s17, %s1877_s21  ;;  %s1882_s18 = scalar_lea.hbm %s2387_s0, 256 }
  0x1c   : > { %p1883_p5 = scmp.lt.s32.totalorder %s2122_s17, %s2387_s0  ;;  %p1884_p8 = scmp.lt.s32.totalorder %s1882_s18, %s1877_s21 }
  0x1d   : > { %p1880_p4 = pnand %p1879_p3, %p1878_p2 }
  0x1e   : > { %p1885_p10 = por %p1884_p8, %p1883_p5 }
  0x1f   : > { %p1881_p7 = pneg %p1880_p4 }
  0x21   : > { %p1886_p9 = pnand %p1885_p10, %p1881_p7 }
  0x23   : > { %1889 = shalt.err (!%p1886_p9)
}
  0x24   : > { %s1890_s22 = scalar_lea.vmem %s2130_s14, 128  ;;  %s1971_s30 = smov [#allocation2]  }
  0x25   : > { %p1891_p0 = scmp.ne.s32.totalorder %s2130_s14, %s1890_s22  ;;  %s1895_s13 = sshll.u32 %s1971_s30, 4  ;;  %s1896_s13 = int_to_ptr.vmem [resolvable:$false] %s1895_s13 }
  0x26   : > { %s1897_s23 = scalar_lea.vmem %s1896_s13, 256  ;;  %p1898_p4 = scmp.lt.s32.totalorder %s2130_s14, %s1896_s13 }
  0x27   : > { %p1893_p1 = pnand %p1891_p0, %p1879_p3  ;;  %p1899_p12 = scmp.lt.s32.totalorder %s1897_s23, %s1890_s22 }
  0x29   : > { %p1894_p2 = pneg %p1893_p1  ;;  %p1900_p11 = por %p1899_p12, %p1898_p4 }
  0x2b   : > { %p1901_p6 = pnand %p1900_p11, %p1894_p2 }
  0x2d   : > { %1904 = shalt.err (!%p1901_p6)
}
  0x2e   : > { %1802 = dma.hbm_to_vmem [thread:$0]  (!%p2126_p13), %s2122_s17, 128, %s2130_s14, %s388_s27  }
  0x2f   : > { %p2420_p9 = scmp.lt.s32.totalorder %s1969_s28, 3  ;;  %p2421_p7 = scmp.ge.s32.totalorder %s1969_s28, 1 }
  0x31   : > { %p404_p0 = pnand %p2421_p7, %p2420_p9 }
  0x32   : > { %s2157_s21 = sand.u32 (!%p404_p0), 1, %s1961_s26   ;;  %p2422_p6 = scmp.ne.s32.totalorder (!%p404_p0), %s2415_s19, 0 }
  0x33   : > { %407 = sbr.rel (%p404_p0) target bundleno = 2473 (0x9a9), region = 72  ;;  %s1633_s13 = sshll.u32 (!%p404_p0), %s2157_s21, 3 }
  0x34   : > { %s410_s24 = scalar_lea.sflag (!%p404_p0), [#allocation3], %s2157_s21  ;;  %s413_s25 = scalar_lea.vmem (!%p404_p0), [#allocation2], %s1633_s13 }
  0x38   : > { %1948 = dma.done.wait (%p2422_p6), %s410_s24, 128  }
  0x39   : > { %1950 = vsyncadd (%p2422_p6), %s410_s24, 4294967168  ;;  %v1972_v0 = vmov 0.0   ;;  %vm1973_vm0 = vmmov 0   ;;  %v460_v1 = vld [vmem:[%s2388_s1 + $0x18] sm:$0xff]  ;;  %v459_v2 = vld [vmem:[%s2388_s1 + $0x10] sm:$0xff]  ;;  %vm468_vm1 = vcmask 261120  }
  0x3a   : > { %1703 = vmatprep.subr.mxu1 %v1972_v0  ;;  %1711 = vmatprep.mubr.msk.f32.mxu1 %vm1973_vm0, %v1972_v0  ;;  %v458_v3 = vld [vmem:[%s2388_s1 + $0x8] sm:$0xff]  ;;  %v457_v4 = vld [vmem:[%s2388_s1] sm:$0xff]  ;;  %s1974_s24 = smov 120   ;;  %s1976_s27 = smov 80   ;;  %vm545_vm2 = vcmask 64512   ;;  %vm1219_vm3 = vcmask 130048  }
  0x3b   : > { %1724 = vmatprep.subr.mxu0 %v1972_v0  ;;  %1726 = vmatprep.mubr.msk.f32.mxu0 %vm1973_vm0, %v1972_v0  ;;  %v2187_v5 = vld [vmem:[%s413_s25] sm:$0xff]  ;;  %s1975_s25 = smov 96   ;;  %s1977_s14 = smov 88   ;;  %vm1221_vm4 = vcmask 195584   ;;  %vm1438_vm5 = vcmask 523264  }
  0x3c   : > { %1704 = vmatpush3.msra.mxu1 %v460_v1  ;;  %v1635_v6 = vld [vmem:[%s2389_s2] ss:$0 sm:$0xff]  ;;  %s1978_s17 = smov 72   ;;  %s1979_s18 = smov 112  }
  0x3d   : > { %1705 = vmatprep.subr.mxu1 %v1972_v0  ;;  %s1980_s19 = smov 104   ;;  %s1981_s15 = smov 56  }
  0x3e   : > { %1706 = vmatpush3.msra.mxu1 %v459_v2  ;;  %s1982_s16 = smov 64   ;;  %s1983_s22 = smov 48  }
  0x3f   : > { %1707 = vmatprep.subr.mxu1 %v1972_v0  ;;  %s1984_s30 = smov 40   ;;  %p2424_p12 = scmp.ne.s32.totalorder %s2416_s20, 0 }
  0x40   : > { %1708 = vmatpush3.msra.mxu1 %v458_v3 }
  0x41   : > { %1709 = vmatprep.subr.mxu1 %v1972_v0 }
  0x42   : > { %1710 = vmatpush3.msra.mxu1 %v457_v4 }
  0x43   : > { %1712 = vmatmul.mubr.msk.f32.vlgmr.msra.gmra.mxu1 %vm468_vm1, %v2187_v5  ;;  %1714 = vmatprep.subr.mxu1 %v1972_v0 }
  0x44   : > { %1716 = vmatprep.mubr.msk.f32.mxu1 %vm1973_vm0, %v1972_v0 }
 0x103   : > { %v538_v7 = vpop.f32.mrf.mxu1 }
 0x104   : > { %v2198_v8 = vadd.f32 %v1635_v6, %v538_v7  ;;  %v1226_v7 = vld [vmem:[%s2390_s3 + $0x18] sm:$0xff] }
 0x105   : > { %v1713_v9 = vpop.f32.mrf.mxu1 }
 0x106   : > { %708 = vrot.lane.b32.xlu1 %v2198_v8, %s1974_s24  ;;  %543 = vrot.lane.b32.xlu0 %v2198_v8, %s1975_s25  ;;  %s1985_s25 = smov 8   ;;  %s1660_s24 = sshll.u32 %s2080_s29, 7 }
 0x10a   : > { %876 = vrot.lane.b32.xlu1 %v2198_v8, %s1976_s27  ;;  %710 = vrot.lane.b32.xlu0 %v2198_v8, %s1977_s14 }
 0x10e   : > { %1042 = vrot.lane.b32.xlu1 %v2198_v8, %s1978_s17  ;;  %874 = vrot.lane.b32.xlu0 %v2198_v8, %s1979_s18  ;;  %s2423_s18 = sld [smem:[#allocation13_spill]] }
 0x112   : > { %1040 = vrot.lane.b32.xlu0 %v2198_v8, %s1980_s19 }
 0x114   : > { %s1555_s19 = scalar_lea.hbm %s2423_s18, %s1660_s24 }
 0x178   : > { %v709_v10 = vpop.permute.xlu1 %708  ;;  %v544_v11 = vpop.permute.xlu0 %543 }
 0x179   : > { %1715 = vmatpush3.xpose.msk.msra.mxu1 %vm545_vm2, %v544_v11 }
 0x17a   : > { %1719 = vmatprep.subr.mxu1 %v1972_v0 }
 0x17c   : > { %1717 = vmatmul.mubr.msk.f32.vlgmr.msra.gmra.mxu1 %vm545_vm2, %v2198_v8  ;;  %v711_v12 = vpop.permute.xlu0 %710  ;;  %v877_v13 = vpop.permute.xlu1 %876 }
 0x17d   : > { %1725 = vmatpush3.xpose.msk.msra.mxu0 %vm545_vm2, %v711_v12  ;;  %1721 = vmatprep.mubr.msk.f32.mxu1 %vm1973_vm0, %v1972_v0  ;;  %v1225_v12 = vld [vmem:[%s2390_s3 + $0x10] sm:$0xff] }
 0x17e   : > { %1734 = vmatprep.subr.mxu0 %v1972_v0 }
 0x180   : > { %1727 = vmatmul.mubr.msk.f32.vlgmr.msra.gmra.mxu0 %vm545_vm2, %v709_v10  ;;  %v875_v14 = vpop.permute.xlu0 %874  ;;  %v1043_v15 = vpop.permute.xlu1 %1042 }
 0x181   : > { %1735 = vmatpush3.xpose.msk.msra.mxu0 %vm545_vm2, %v877_v13  ;;  %1736 = vmatprep.mubr.msk.f32.mxu0 %vm1973_vm0, %v1972_v0  ;;  %v1224_v13 = vld [vmem:[%s2390_s3 + $0x8] sm:$0xff] }
 0x182   : > { %1744 = vmatprep.subr.mxu0 %v1972_v0 }
 0x184   : > { %1737 = vmatmul.mubr.msk.f32.vlgmr.msra.gmra.mxu0 %vm545_vm2, %v875_v14  ;;  %v1041_v16 = vpop.permute.xlu0 %1040  ;;  %v1223_v14 = vld [vmem:[%s2390_s3] sm:$0xff] }
 0x185   : > { %1745 = vmatpush3.xpose.msk.msra.mxu0 %vm545_vm2, %v1043_v15  ;;  %1746 = vmatprep.mubr.msk.f32.mxu0 %vm1973_vm0, %v1972_v0 }
 0x186   : > { %1754 = vmatprep.subr.mxu0 %v1972_v0 }
 0x188   : > { %1747 = vmatmul.mubr.msk.f32.vlgmr.msra.gmra.mxu0 %vm545_vm2, %v1041_v16 }
 0x189   : > { %1762 = vmatprep.mubr.msk.f32.mxu0 %vm1973_vm0, %v1972_v0  ;;  %1755 = vmatpush3.msra.mxu0 %v1226_v7 }
 0x18a   : > { %1756 = vmatprep.subr.mxu0 %v1972_v0 }
 0x18b   : > { %1757 = vmatpush3.msra.mxu0 %v1225_v12 }
 0x18c   : > { %1758 = vmatprep.subr.mxu0 %v1972_v0 }
 0x18d   : > { %1759 = vmatpush3.msra.mxu0 %v1224_v13  ;;  %v1657_v13 = vld [vmem:[%s2398_s11] ss:$0 sm:$0xff] }
 0x18e   : > { %1760 = vmatprep.subr.mxu0 %v1972_v0 }
 0x18f   : > { %1761 = vmatpush3.msra.mxu0 %v1223_v14 }
 0x190   : > { %1776 = vmatprep.subr.mxu0 %v1972_v0 }
 0x23c   : > { %v616_v17 = vpop.f32.mrf.mxu1 }
 0x23d   : > { %v620_v18 = vmul.f32 0.35355338, %v616_v17 }
 0x23e   : > { %v1718_v19 = vpop.f32.mrf.mxu1 }
 0x23f   : > { %v621_v20 = vsel %vm545_vm2, %v620_v18, -inf }
 0x240   : > { %v782_v21 = vpop.f32.mrf.mxu0  ;;  %622 = vmax.xlane.f32.xlu1 %v621_v20 }
 0x241   : > { %v786_v22 = vmul.f32 0.35355338, %v782_v21 }
 0x242   : > { %v1728_v23 = vpop.f32.mrf.mxu0 }
 0x243   : > { %v787_v24 = vsel %vm545_vm2, %v786_v22, -inf }
 0x244   : > { %788 = vmax.xlane.f32.xlu0 %v787_v24  ;;  %v948_v25 = vpop.f32.mrf.mxu0 }
 0x245   : > { %v952_v26 = vmul.f32 0.35355338, %v948_v25  ;;  %v1649_v25 = vld [vmem:[%s2391_s4] ss:$0 sm:$0xff] }
 0x246   : > { %v1738_v27 = vpop.f32.mrf.mxu0 }
 0x247   : > { %v953_v28 = vsel %vm545_vm2, %v952_v26, -inf }
 0x248   : > { %954 = vmax.xlane.f32.xlu0 %v953_v28  ;;  %v1114_v29 = vpop.f32.mrf.mxu0 }
 0x249   : > { %v1118_v30 = vmul.f32 0.35355338, %v1114_v29 }
 0x24a   : > { %v1748_v31 = vpop.f32.mrf.mxu0 }
 0x24b   : > { %v1119_v32 = vsel %vm545_vm2, %v1118_v30, -inf }
 0x24c   : > { %1120 = vmax.xlane.f32.xlu1 %v1119_v32 }
 0x25d   : > { %798 = vrot.lane.b32.xlu1 %v2198_v8, %s1981_s15  ;;  %s1544_s15 = scalar_lea.sflag [#allocation4], %s2157_s21 }
 0x2c9   : > { %v623_v33 = vpop.xlane.xlu1 %622 }
 0x2ca   : > { %v624_v34 = vsub.f32 %v620_v18, %v623_v33 }
 0x2cc   : > { %v625_v35 = vmul.f32 1.442695, %v624_v34 }
 0x2cd   : > { %v789_v36 = vpop.xlane.xlu0 %788 }
 0x2ce   : > { %1857 = vpow2.f32 %v625_v35  ;;  %v790_v37 = vsub.f32 %v786_v22, %v789_v36  ;;  %v1341_v36 = vld [vmem:[%s2394_s7 + $0x18] sm:$0xff] }
 0x2d0   : > { %v791_v38 = vmul.f32 1.442695, %v790_v37  ;;  %v1340_v37 = vld [vmem:[%s2394_s7 + $0x10] sm:$0xff] }
 0x2d1   : > { %v955_v48 = vpop.xlane.xlu0 %954 }
 0x2d2   : > { %1859 = vpow2.f32 %v791_v38  ;;  %v956_v49 = vsub.f32 %v952_v26, %v955_v48  ;;  %v1338_v38 = vld [vmem:[%s2394_s7] sm:$0xff] }
 0x2d3   : > { %v1651_v48 = vld [vmem:[%s2392_s5] ss:$0 sm:$0xff] }
 0x2d4   : > { %v957_v50 = vmul.f32 1.442695, %v956_v49 }
 0x2d5   : > { %v1121_v39 = vpop.xlane.xlu1 %1120 }
 0x2d6   : > { %v1122_v40 = vsub.f32 %v1118_v30, %v1121_v39  ;;  %v1430_v39 = vld [vmem:[%s2396_s9 + $0x38] sm:$0xff] }
 0x2d8   : > { %v1123_v41 = vmul.f32 1.442695, %v1122_v40  ;;  %v1429_v40 = vld [vmem:[%s2396_s9 + $0x30] sm:$0xff] }
 0x2d9   : > { %v799_v53 = vpop.permute.xlu1 %798 }
 0x2da   : > { %1861 = vpow2.f32 %v1123_v41  ;;  %v1428_v41 = vld [vmem:[%s2396_s9 + $0x28] sm:$0xff] }
 0x2db   : > { %v1858_v42 = vpop.eup %1857  ;;  %1863 = vpow2.f32 %v957_v50  ;;  %v1652_v50 = vld [vmem:[%s2393_s6] ss:$0 sm:$0xff] }
 0x2dc   : > { %v627_v43 = vsel %vm545_vm2, %v1858_v42, 0.0 }
 0x2dd   : > { %628 = vadd.xlane.f32.xlu0 %v627_v43  ;;  %v1426_v43 = vld [vmem:[%s2396_s9 + $0x18] sm:$0xff] }
 0x2df   : > { %v1860_v44 = vpop.eup %1859 }
 0x2e0   : > { %v793_v45 = vsel %vm545_vm2, %v1860_v44, 0.0 }
 0x2e1   : > { %794 = vadd.xlane.f32.xlu1 %v793_v45 }
 0x2e7   : > { %v1862_v46 = vpop.eup %1861 }
 0x2e8   : > { %v1125_v47 = vsel %vm545_vm2, %v1862_v46, 0.0  ;;  %v1864_v51 = vpop.eup %1863 }
 0x2e9   : > { %1126 = vadd.xlane.f32.xlu1 %v1125_v47  ;;  %v959_v52 = vsel %vm545_vm2, %v1864_v51, 0.0 }
 0x2f3   : > { %632 = vrot.lane.b32.xlu0 %v2198_v8, %s1982_s16  ;;  %s1986_s16 = smov 16  }
 0x2fa   : > { %964 = vrot.lane.b32.xlu1 %v2198_v8, %s1983_s22  ;;  %s1987_s22 = smov 24  }
 0x312   : > { %960 = vadd.xlane.f32.xlu0 %v959_v52 }
 0x328   : > { %1130 = vrot.lane.b32.xlu0 %v2198_v8, %s1984_s30 }
 0x366   : > { %v629_v54 = vpop.xlane.xlu0 %628 }
 0x367   : > { %1865 = vrcp.f32 %v629_v54  ;;  %v1424_v54 = vld [vmem:[%s2396_s9 + $0x8] sm:$0xff] }
 0x36a   : > { %v633_v55 = vpop.permute.xlu0 %632  ;;  %v795_v56 = vpop.xlane.xlu1 %794 }
 0x36b   : > { %1867 = vrcp.f32 %v795_v56  ;;  %1720 = vmatpush3.msra.mxu1 %v633_v55  ;;  %v1423_v55 = vld [vmem:[%s2396_s9] sm:$0xff] }
 0x36c   : > { %1729 = vmatprep.subr.mxu1 %v1972_v0  ;;  %v1653_v56 = vld [vmem:[%s2395_s8] ss:$0 sm:$0xff] }
 0x372   : > { %v1127_v58 = vpop.xlane.xlu1 %1126 }
 0x374   : > { %v1866_v57 = vpop.eup %1865 }
 0x375   : > { %v631_v59 = vmul.f32 %v1866_v57, %v1858_v42  ;;  %v1427_v42 = vld [vmem:[%s2396_s9 + $0x20] sm:$0xff] }
 0x376   : > { %v965_v62 = vpop.permute.xlu1 %964 }
 0x377   : > { %1722 = vmatmul.mubr.msk.f32.vlgmr.msra.gmra.mxu1 %vm545_vm2, %v631_v59 }
 0x378   : > { %v1868_v60 = vpop.eup %1867  ;;  %1730 = vmatpush3.msra.mxu1 %v799_v53  ;;  %1731 = vmatprep.mubr.msk.f32.mxu1 %vm1973_vm0, %v1972_v0  ;;  %v1425_v53 = vld [vmem:[%s2396_s9 + $0x10] sm:$0xff] }
 0x379   : > { %1739 = vmatprep.subr.mxu1 %v1972_v0  ;;  %v797_v61 = vmul.f32 %v1868_v60, %v1860_v44 }
 0x37b   : > { %1732 = vmatmul.mubr.msk.f32.vlgmr.msra.gmra.mxu1 %vm545_vm2, %v797_v61  ;;  %v1655_v61 = vld [vmem:[%s2397_s10] ss:$0 sm:$0xff] }
 0x37c   : > { %1740 = vmatpush3.msra.mxu1 %v965_v62  ;;  %1741 = vmatprep.mubr.msk.f32.mxu1 %vm1973_vm0, %v1972_v0 }
 0x37d   : > { %1749 = vmatprep.subr.mxu1 %v1972_v0 }
 0x39b   : > { %v961_v63 = vpop.xlane.xlu0 %960 }
 0x39c   : > { %1869 = vrcp.f32 %v961_v63 }
 0x39d   : > { %1871 = vrcp.f32 %v1127_v58 }
 0x39f   : > { %v1131_v4 = vpop.permute.xlu0 %1130 }
 0x3a9   : > { %v1870_v1 = vpop.eup %1869 }
 0x3aa   : > { %v963_v2 = vmul.f32 %v1870_v1, %v1864_v51  ;;  %v1872_v3 = vpop.eup %1871 }
 0x3ab   : > { %v1129_v6 = vmul.f32 %v1872_v3, %v1862_v46 }
 0x3ac   : > { %1742 = vmatmul.mubr.msk.f32.vlgmr.msra.gmra.mxu1 %vm545_vm2, %v963_v2 }
 0x3ad   : > { %1750 = vmatpush3.msra.mxu1 %v1131_v4  ;;  %1751 = vmatprep.mubr.msk.f32.mxu1 %vm1973_vm0, %v1972_v0 }
 0x3ae   : > { %1765 = vmatprep.subr.mxu1 %v1972_v0 }
 0x3b0   : > { %1752 = vmatmul.mubr.msk.f32.vlgmr.msra.gmra.mxu1 %vm545_vm2, %v1129_v6 }
 0x3b1   : > { %1773 = vmatprep.mubr.msk.f32.mxu1 %vm1973_vm0, %v1972_v0  ;;  %1766 = vmatpush3.msra.mxu1 %v1341_v36 }
 0x3b2   : > { %1767 = vmatprep.subr.mxu1 %v1972_v0 }
 0x3b3   : > { %1768 = vmatpush3.msra.mxu1 %v1340_v37 }
 0x3b4   : > { %1769 = vmatprep.subr.mxu1 %v1972_v0 }
 0x437   : > { %v704_v8 = vpop.f32.mrf.mxu1 }
 0x439   : > { %v1723_v9 = vpop.f32.mrf.mxu1 }
 0x43b   : > { %v870_v10 = vpop.f32.mrf.mxu1 }
 0x43c   : > { %1207 = vrot.lane.b32.xlu1 %v870_v10, %s1985_s25  ;;  %s455_s25 = scalar_lea.vmem [#allocation5], %s1633_s13 }
 0x43d   : > { %v1733_v11 = vpop.f32.mrf.mxu1  ;;  %s1557_s27 = sshll.u32 %s455_s25, 4  ;;  %s1558_s27 = int_to_ptr.vmem [resolvable:$true] %s1557_s27 }
 0x46c   : > { %v1036_v15 = vpop.f32.mrf.mxu1 }
 0x46d   : > { %1211 = vrot.lane.b32.xlu0 %v1036_v15, %s1986_s16  ;;  %v1658_v15 = vld [vmem:[%s2399_s12] ss:$0 sm:$0xff]  ;;  %s1905_s16 = scalar_lea.vmem %s1558_s27, 128 }
 0x46e   : > { %v1743_v16 = vpop.f32.mrf.mxu1  ;;  %p1906_p11 = scmp.ne.s32.totalorder %s1558_s27, %s1905_s16 }
 0x470   : > { %v1202_v17 = vpop.f32.mrf.mxu1  ;;  %p1907_p13 = pnand %p1906_p11, %p2424_p12 }
 0x471   : > { %1215 = vrot.lane.b32.xlu1 %v1202_v17, %s1987_s22  ;;  %s1988_s22 = smov [#allocation5]  }
 0x472   : > { %v1753_v18 = vpop.f32.mrf.mxu1  ;;  %p1908_p1 = pneg %p1907_p13  ;;  %s1909_s29 = sshll.u32 %s1988_s22, 4  ;;  %s1910_s29 = int_to_ptr.vmem [resolvable:$false] %s1909_s29 }
 0x473   : > { %s1911_s13 = scalar_lea.vmem %s1910_s29, 256  ;;  %p1912_p3 = scmp.lt.s32.totalorder %s1558_s27, %s1910_s29 }
 0x474   : > { %p1913_p5 = scmp.lt.s32.totalorder %s1911_s13, %s1905_s16 }
 0x476   : > { %p1914_p8 = por %p1913_p5, %p1912_p3 }
 0x478   : > { %p1915_p10 = pnand %p1914_p8, %p1908_p1 }
 0x4ae   : > { %v1208_v19 = vpop.permute.xlu1 %1207 }
 0x4af   : > { %v1218_v21 = vsel %vm545_vm2, %v704_v8, %v1208_v19 }
 0x4df   : > { %v1212_v20 = vpop.permute.xlu0 %1211 }
 0x4e0   : > { %v1220_v22 = vsel %vm1219_vm3, %v1218_v21, %v1212_v20 }
 0x4e3   : > { %v1216_v23 = vpop.permute.xlu1 %1215 }
 0x4e4   : > { %v1222_v24 = vsel %vm1221_vm4, %v1220_v22, %v1216_v23 }
 0x4e5   : > { %1763 = vmatmul.mubr.msk.f32.vlgmr.msra.gmra.mxu0 %vm468_vm1, %v1222_v24 }
 0x4e6   : > { %1792 = vmatprep.mubr.msk.f32.mxu0 %vm1973_vm0, %v1972_v0  ;;  %1777 = vmatpush3.msra.mxu0 %v1430_v39 }
 0x4e7   : > { %1778 = vmatprep.subr.mxu0 %v1972_v0 }
 0x4e8   : > { %1779 = vmatpush3.msra.mxu0 %v1429_v40 }
 0x4e9   : > { %1780 = vmatprep.subr.mxu0 %v1972_v0 }
 0x4ea   : > { %1781 = vmatpush3.msra.mxu0 %v1428_v41 }
 0x4eb   : > { %1782 = vmatprep.subr.mxu0 %v1972_v0 }
 0x4ec   : > { %1783 = vmatpush3.msra.mxu0 %v1427_v42 }
 0x4ed   : > { %1784 = vmatprep.subr.mxu0 %v1972_v0 }
 0x4ee   : > { %1785 = vmatpush3.msra.mxu0 %v1426_v43 }
 0x4ef   : > { %1786 = vmatprep.subr.mxu0 %v1972_v0 }
 0x4f0   : > { %1787 = vmatpush3.msra.mxu0 %v1425_v53 }
 0x4f1   : > { %1788 = vmatprep.subr.mxu0 %v1972_v0 }
 0x4f2   : > { %1789 = vmatpush3.msra.mxu0 %v1424_v54 }
 0x4f3   : > { %1790 = vmatprep.subr.mxu0 %v1972_v0 }
 0x4f4   : > { %1791 = vmatpush3.msra.mxu0 %v1423_v55 }
 0x5a5   : > { %v1303_v26 = vpop.f32.mrf.mxu0 }
 0x5a6   : > { %v1304_v27 = vadd.f32 %v1649_v25, %v1303_v26 }
 0x5a7   : > { %v1764_v28 = vpop.f32.mrf.mxu0 }
 0x5a8   : > { %v1307_v29 = vadd.f32 %v1304_v27, %v2187_v5  ;;  %v1339_v5 = vld [vmem:[%s2394_s7 + $0x8] sm:$0xff] }
 0x5a9   : > { %1770 = vmatpush3.msra.mxu1 %v1339_v5 }
 0x5aa   : > { %v1310_v30 = vsel %vm468_vm1, %v1307_v29, 0.0  ;;  %1771 = vmatprep.subr.mxu1 %v1972_v0 }
 0x5ab   : > { %1311 = vadd.xlane.f32.xlu0 %v1310_v30  ;;  %1772 = vmatpush3.msra.mxu1 %v1338_v38 }
 0x634   : > { %v1312_v31 = vpop.xlane.xlu0 %1311 }
 0x635   : > { %v1314_v32 = vmul.f32 0.03125, %v1312_v31 }
 0x637   : > { %v1315_v33 = vsub.f32 %v1307_v29, %v1314_v32 }
 0x639   : > { %v1316_v34 = vmul.f32 %v1315_v33, %v1315_v33 }
 0x63b   : > { %v1317_v35 = vsel %vm468_vm1, %v1316_v34, 0.0 }
 0x63c   : > { %1318 = vadd.xlane.f32.xlu1 %v1317_v35 }
 0x6c5   : > { %v1319_v44 = vpop.xlane.xlu1 %1318 }
 0x6c6   : > { %v1320_v45 = vmul.f32 0.03125, %v1319_v44 }
 0x6c8   : > { %v1321_v46 = vadd.f32 1e-05, %v1320_v45 }
 0x6ca   : > { %1873 = vrsqrt.f32 %v1321_v46 }
 0x6d7   : > { %v1874_v47 = vpop.eup %1873 }
 0x6d8   : > { %v1323_v49 = vmul.f32 %v1874_v47, %v1315_v33 }
 0x6da   : > { %v1330_v51 = vmul.f32 %v1651_v48, %v1323_v49 }
 0x6dc   : > { %v1337_v52 = vadd.f32 %v1652_v50, %v1330_v51 }
 0x6de   : > { %1774 = vmatmul.mubr.msk.f32.vlgmr.msra.gmra.mxu1 %vm468_vm1, %v1337_v52 }
 0x79e   : > { %v1418_v57 = vpop.f32.mrf.mxu1 }
 0x79f   : > { %v1419_v58 = vadd.f32 %v1653_v56, %v1418_v57 }
 0x7a0   : > { %v1775_v59 = vpop.f32.mrf.mxu1 }
 0x7a1   : > { %v1422_v60 = vmax.f32 %v1419_v58, 0.0 }
 0x7a3   : > { %1793 = vmatmul.mubr.msk.f32.vlgmr.msra.gmra.mxu0 %vm1438_vm5, %v1422_v60 }
 0x863   : > { %v1508_v62 = vpop.f32.mrf.mxu0 }
 0x864   : > { %v1509_v63 = vadd.f32 %v1655_v61, %v1508_v62 }
 0x865   : > { %v1794_v1 = vpop.f32.mrf.mxu0 }
 0x866   : > { %v1512_v2 = vadd.f32 %v1509_v63, %v1337_v52 }
 0x868   : > { %v1515_v0 = vsel %vm468_vm1, %v1512_v2, 0.0 }
 0x869   : > { %1516 = vadd.xlane.f32.xlu0 %v1515_v0 }
 0x8f2   : > { %v1517_v3 = vpop.xlane.xlu0 %1516 }
 0x8f3   : > { %v1518_v4 = vmul.f32 0.03125, %v1517_v3 }
 0x8f5   : > { %v1519_v6 = vsub.f32 %v1512_v2, %v1518_v4 }
 0x8f7   : > { %v1520_v7 = vmul.f32 %v1519_v6, %v1519_v6 }
 0x8f9   : > { %v1521_v8 = vsel %vm468_vm1, %v1520_v7, 0.0 }
 0x8fa   : > { %1522 = vadd.xlane.f32.xlu0 %v1521_v8 }
 0x983   : > { %v1523_v9 = vpop.xlane.xlu0 %1522 }
 0x984   : > { %v1524_v10 = vmul.f32 0.03125, %v1523_v9 }
 0x986   : > { %v1525_v11 = vadd.f32 1e-05, %v1524_v10 }
 0x988   : > { %1875 = vrsqrt.f32 %v1525_v11 }
 0x995   : > { %v1876_v12 = vpop.eup %1875 }
 0x996   : > { %v1527_v14 = vmul.f32 %v1876_v12, %v1519_v6 }
 0x998   : > { %v1534_v16 = vmul.f32 %v1657_v13, %v1527_v14 }
 0x99a   : > { %v1541_v17 = vadd.f32 %v1658_v15, %v1534_v16 }
 0x99c   : > { %1542 = vst.msk [vmem:[%s455_s25] sm:$0xff] %vm468_vm1, %v1541_v17 }
 0x99d   : > { %1918 = shalt.err (!%p1915_p10)
}
 0x99e   : > { %s1919_s30 = scalar_lea.hbm %s1555_s19, 128  ;;  %s1923_s24 = scalar_lea.hbm %s2423_s18, 256 }
 0x99f   : > { %p1920_p2 = scmp.ne.s32.totalorder %s1555_s19, %s1919_s30  ;;  %p1924_p7 = scmp.lt.s32.totalorder %s1555_s19, %s2423_s18 }
 0x9a0   : > { %p1925_p0 = scmp.lt.s32.totalorder %s1923_s24, %s1919_s30 }
 0x9a1   : > { %p1921_p4 = pnand %p1920_p2, %p2424_p12 }
 0x9a2   : > { %p1926_p6 = por %p1925_p0, %p1924_p7 }
 0x9a3   : > { %p1922_p9 = pneg %p1921_p4 }
 0x9a5   : > { %p1927_p11 = pnand %p1926_p6, %p1922_p9 }
 0x9a7   : > { %1930 = shalt.err (!%p1927_p11)
}
 0x9a8   : > { %1797 = dma.vmem_to_hbm [thread:$0]  (%p2424_p12), %s1558_s27, 128, %s1555_s19, %s1544_s15  }
 0x9a9 PF: > { %s2425_s17 = sld [smem:[#allocation8_spill]]  ;;  %p2428_p1 = scmp.ge.s32.totalorder %s1969_s28, 2 }
 0x9aa   : > { %s2426_s16 = sld [smem:[#allocation12_spill]] }
 0x9af   : > { %s1569_s22 = sand.u32 1, %s2425_s17  }
 0x9b0   : > { %p2427_p13 = scmp.ne.s32.totalorder %s2426_s16, 0  ;;  %s1570_s29 = scalar_lea.sflag [#allocation4], %s1569_s22 }
 0x9b2   : > { %p1804_p3 = pnand %p2428_p1, %p2427_p13 }
 0x9b4   : > { %p1805_p5 = pneg %p1804_p3 }
 0x9b6   : > { %1952 = dma.done.wait (%p1805_p5), %s1570_s29, 128  }
 0x9b7   : > { %1954 = vsyncadd (%p1805_p5), %s1570_s29, 4294967168  ;;  %s2429_s28 = sld [smem:[#allocation10_spill]]  ;;  %s2432_s25 = smov %s1961_s26 }
 0x9b8   : > { %s2430_s13 = sld [smem:[#allocation9_spill]] }
 0x9b9   : > { %s2431_s27 = sld [smem:[#allocation11_spill]] }
 0x9bd   : > { %p26_p8 = scmp.ge.s32.totalorder %s2429_s28, 4  }
 0x9be   : > { %s2433_s26 = smov %s2430_s13 }
 0x9bf   :  { %28 = sbr.rel (!%p26_p8) target bundleno = 7 (0x7), region = 117 }
 0x9c4   :  { %1575 = vsyncpa [#allocation3], 1 }
 0x9c5   :  { %1577 = vsyncpa [#allocation3 + $0x1], 1 }
 0x9c6   :  { %1578 = vsyncpa [#allocation4], 1 }
 0x9c7   :  { %1580 = vsyncpa [#allocation4 + $0x1], 1 }

</bundles_post_ra>
